<compile_context>
chip_gen: v5e
topology: v5e:2x2
jax: 0.10.0
libtpu: 0.0.40
codegen_flags: <defaults>
</compile_context>

<pallas_src>
import functools
import math

import jax
import jax.numpy as jnp
from jax.experimental import pallas as pl
from jax.experimental.pallas import tpu as pltpu


def _graddrop_kernel(*refs, leakage, use_sign):
    """One lane-tile of GradDrop.

    Block shapes:
      use_sign=True  : grads (K, R, td), inputs (R, td), samples (R, td), out (K, R, td)
      use_sign=False : grads (K, B, td),                 samples (1, td), out (K, B, td)
    """
    if use_sign:
        grads_ref, inputs_ref, samples_ref, out_ref = refs
    else:
        grads_ref, samples_ref, out_ref = refs

    K = grads_ref.shape[0]
    gf = grads_ref[...].astype(jnp.float32)                       # (K, rows_g, td)

    if use_sign:
        # 1-D per-task gradient branch: sign(inputs) * grads[i]
        s_in = jnp.sign(inputs_ref[...].astype(jnp.float32))      # (R, td)
        sg = s_in[None, :, :] * gf                                # (K, R, td)
    else:
        # multi-dim branch: grads[i].sum(dim=0, keepdim=True)
        sg = jnp.sum(gf, axis=1, keepdims=True)                   # (K, 1, td)

    s_sum = jnp.sum(sg, axis=0)                                   # (rows, td)
    s_abs = jnp.sum(jnp.abs(sg), axis=0)                          # (rows, td)
    # NOTE: plain divide on a tiny (rows, td) slab; pl.reciprocal(approx=True)
    # would move it to the EUP slot but is skipped for interpret-mode safety.
    odds = jnp.clip(0.5 * (1.0 + s_sum / (s_abs + 1e-15)), 0.0, 1.0)

    samples = samples_ref[...].astype(jnp.float32)                # (rows, td)
    # Hoisted: the two comparisons are shared by every task.
    gt = odds > samples
    lt = odds < samples
    keep = (gt[None] & (sg > 0.0)) | (lt[None] & (sg < 0.0))      # (K, rows, td)

    masks = []
    for i in range(K):                                            # K small & static -> unrolled
        leak = float(leakage[i])
        if leak >= 1.0:
            # torch.lerp(mask, 1, 1.0) == 1 -> gradient passes through untouched.
            masks.append(jnp.ones_like(s_sum))
        elif leak <= 0.0:
            masks.append(keep[i].astype(jnp.float32))
        else:
            m = keep[i].astype(jnp.float32)
            masks.append(m + leak * (1.0 - m))                    # torch.lerp(m, 1, leak)
    mask = jnp.stack(masks, axis=0)                               # (K, rows, td)

    # Single wide lane-dense store; mask broadcasts over B when rows == 1.
    out_ref[...] = (mask * gf).astype(out_ref.dtype)


def _round_up(x, m):
    return ((x + m - 1) // m) * m


def _pad_last(x, target):
    pad = target - x.shape[-1]
    if pad == 0:
        return x
    return jnp.pad(x, [(0, 0)] * (x.ndim - 1) + [(0, pad)])


def _pick_lane_tile(c, bytes_per_lane, budget_bytes):
    """Largest multiple-of-128 divisor of `c` whose pipelined footprint fits the budget."""
    cap = max(128, (budget_bytes // max(bytes_per_lane, 1)) // 128 * 128)
    best = 128
    t = 128
    limit = min(c, cap)
    while t <= limit:
        if c % t == 0:
            best = t
        t += 128
    return best


def graddrop(grads, inputs, leakage, *, key=None, seed=0):
    """GradDrop forward: returns new per-task gradients, same shape/dtype as `grads`."""
    grads = jnp.asarray(grads)
    inputs = jnp.asarray(inputs)
    K = grads.shape[0]
    assert len(leakage) == K, "Leakage parameters should match the number of task gradients"
    assert all(0.0 <= float(x) <= 1.0 for x in leakage), "All leakages should be in [0, 1]"
    leakage = tuple(float(x) for x in leakage)
    orig_shape = grads.shape

    if key is None:
        key = jax.random.PRNGKey(seed)

    itemsize = jnp.dtype(grads.dtype).itemsize
    # Conservative per-step VMEM budget: safe even against v7x's 64 MiB physical VMEM
    # (scoped limit raised explicitly via vmem_limit_bytes below).
    budget = 8 * 1024 * 1024

    if grads.ndim == 2:
        # ---------- 1-D per-task gradients ----------
        use_sign = True
        D = grads.shape[1]
        d_pad = _round_up(D, 128)
        # Fold D into (R, C) to fill the sublane dimension (R in {1, 2, 4, 8}).
        R = math.gcd(8, d_pad // 128)
        C = d_pad // R

        samples = jax.random.uniform(key, (D,), dtype=jnp.float32)  # == torch.rand(odds.size())

        grads_k = _pad_last(grads.reshape(K, D), d_pad).reshape(K, R, C)
        inputs_k = _pad_last(inputs.reshape(D), d_pad).reshape(R, C)
        samples_k = _pad_last(samples, d_pad).reshape(R, C)

        bytes_per_lane = 2 * ((2 * K * R + R) * itemsize + 2 * R * 4)
        td = _pick_lane_tile(C, bytes_per_lane, budget)
        grid = (C // td,)

        in_specs = [
            pl.BlockSpec((K, R, td), lambda j: (0, 0, j)),
            pl.BlockSpec((R, td), lambda j: (0, j)),
            pl.BlockSpec((R, td), lambda j: (0, j)),
        ]
        out_spec = pl.BlockSpec((K, R, td), lambda j: (0, 0, j))
        operands = (grads_k, inputs_k, samples_k)
        out_kernel_shape = (K, R, C)
    else:
        # ---------- multi-dim per-task gradients ----------
        use_sign = False
        B = grads.shape[1]
        D = math.prod(grads.shape[2:])
        d_pad = _round_up(D, 128)

        samples = jax.random.uniform(key, (D,), dtype=jnp.float32)

        grads_k = _pad_last(grads.reshape(K, B, D), d_pad)
        samples_k = _pad_last(samples.reshape(1, D), d_pad)

        bytes_per_lane = 2 * (2 * K * B * itemsize + 4)
        td = _pick_lane_tile(d_pad, bytes_per_lane, budget)
        grid = (d_pad // td,)

        in_specs = [
            pl.BlockSpec((K, B, td), lambda j: (0, 0, j)),
            pl.BlockSpec((1, td), lambda j: (0, j)),
        ]
        out_spec = pl.BlockSpec((K, B, td), lambda j: (0, 0, j))
        operands = (grads_k, samples_k)
        out_kernel_shape = (K, B, d_pad)

    kernel = functools.partial(_graddrop_kernel, leakage=leakage, use_sign=use_sign)

    out = pl.pallas_call(
        kernel,
        out_shape=jax.ShapeDtypeStruct(out_kernel_shape, grads.dtype),
        grid=grid,
        in_specs=in_specs,
        out_specs=out_spec,
        compiler_params=pltpu.CompilerParams(
            # Every lane tile is independent -> "parallel" lets v7x shard the grid
            # across both TensorCores (no-op on single-TC v5e/v6e).
            dimension_semantics=("parallel",),
            vmem_limit_bytes=64 * 1024 * 1024,
        ),
        # TODO(synk): could add input_output_aliases to alias grads -> output and save
        # one (K, B, D) HBM allocation; skipped to keep the call maximally portable.
    )(*operands)

    if use_sign:
        out = out.reshape(K, d_pad)[:, :D]
    else:
        out = out.reshape(K, orig_shape[1], d_pad)[:, :, :D]
    return out.reshape(orig_shape)


if __name__ == "__main__":
    key = jax.random.PRNGKey(0)
    k1, k2, k3, k4 = jax.random.split(key, 4)

    # --- multi-dim gradient case: K=3 tasks, each gradient is (B=8, D=256) ---
    K, B, D = 3, 8, 256
    grads = jax.random.normal(k1, (K, B, D), dtype=jnp.float32)
    inputs = jax.random.normal(k2, (B, D), dtype=jnp.float32)
    leakage = [0.0, 0.5, 1.0]
    out = jax.block_until_ready(graddrop(grads, inputs, leakage, seed=42))

    assert out.shape == grads.shape and out.dtype == grads.dtype
    assert bool(jnp.all(jnp.isfinite(out)))
    # leakage == 1.0 -> mask lerps to all-ones -> gradient passes through unchanged
    assert bool(jnp.allclose(out[2], grads[2]))
    # leakage == 0.0 -> every element is either dropped (0) or kept exactly
    assert bool(jnp.all((out[0] == 0.0) | (out[0] == grads[0])))

    # --- 1-D gradient case: K=4 tasks, each gradient is (D=256,) ---
    K2, D2 = 4, 256
    grads1d = jax.random.normal(k3, (K2, D2), dtype=jnp.float32)
    inputs1d = jax.random.normal(k4, (D2,), dtype=jnp.float32)
    out1d = jax.block_until_ready(
        graddrop(grads1d, inputs1d, [0.25, 0.5, 0.75, 1.0], seed=7))
    assert out1d.shape == grads1d.shape and out1d.dtype == grads1d.dtype
    assert bool(jnp.all(jnp.isfinite(out1d)))
    assert bool(jnp.allclose(out1d[3], grads1d[3]))

    print("KERNEL_OK")
</pallas_src>

<mosaic_0001>
module attributes {stable_mosaic.version = 11 : i64} {
  func.func @_graddrop_kernel(%arg0: i32, %arg1: memref<3x8x256xf32, #tpu.memory_space<vmem>>, %arg2: memref<1x256xf32, #tpu.memory_space<vmem>>, %arg3: memref<3x8x256xf32, #tpu.memory_space<vmem>>) attributes {dimension_semantics = [#tpu.dimension_semantics<parallel>], iteration_bounds = array<i64: 1>, scalar_prefetch = 0 : i64, scratch_operands = 0 : i64, tpu.core_type = #tpu.core_type<tc>, window_params = [{transform_indices = @transform_0, window_bounds = array<i64: 3, 8, 256>}, {transform_indices = @transform_1, window_bounds = array<i64: 1, 256>}, {transform_indices = @transform_2, window_bounds = array<i64: 3, 8, 256>}]} {
    %c0 = arith.constant 0 : index
    %c0_0 = arith.constant 0 : index
    %c0_1 = arith.constant 0 : index
    %0 = vector.load %arg1[%c0, %c0_0, %c0_1] : memref<3x8x256xf32, #tpu.memory_space<vmem>>, vector<3x8x256xf32>
    %cst = arith.constant dense<0.000000e+00> : vector<3x256xf32>
    %1 = vector.multi_reduction <add>, %0, %cst [1] : vector<3x8x256xf32> to vector<3x256xf32>
    %2 = vector.shape_cast %1 : vector<3x256xf32> to vector<3x1x256xf32>
    %cst_2 = arith.constant dense<0.000000e+00> : vector<1x256xf32>
    %3 = vector.multi_reduction <add>, %2, %cst_2 [0] : vector<3x1x256xf32> to vector<1x256xf32>
    %4 = math.absf %2 : vector<3x1x256xf32>
    %cst_3 = arith.constant dense<0.000000e+00> : vector<1x256xf32>
    %5 = vector.multi_reduction <add>, %4, %cst_3 [0] : vector<3x1x256xf32> to vector<1x256xf32>
    %cst_4 = arith.constant 1.000000e-15 : f32
    %6 = vector.broadcast %cst_4 : f32 to vector<1x256xf32>
    %7 = arith.addf %5, %6 : vector<1x256xf32>
    %8 = arith.divf %3, %7 : vector<1x256xf32>
    %cst_5 = arith.constant 1.000000e+00 : f32
    %9 = vector.broadcast %cst_5 : f32 to vector<1x256xf32>
    %10 = arith.addf %9, %8 : vector<1x256xf32>
    %cst_6 = arith.constant 5.000000e-01 : f32
    %11 = vector.broadcast %cst_6 : f32 to vector<1x256xf32>
    %12 = arith.mulf %11, %10 : vector<1x256xf32>
    %cst_7 = arith.constant 0.000000e+00 : f32
    %cst_8 = arith.constant 1.000000e+00 : f32
    %13 = vector.broadcast %cst_7 : f32 to vector<1x256xf32>
    %14 = arith.maximumf %13, %12 : vector<1x256xf32>
    %15 = vector.broadcast %cst_8 : f32 to vector<1x256xf32>
    %16 = arith.minimumf %15, %14 : vector<1x256xf32>
    %c0_9 = arith.constant 0 : index
    %c0_10 = arith.constant 0 : index
    %17 = vector.load %arg2[%c0_9, %c0_10] : memref<1x256xf32, #tpu.memory_space<vmem>>, vector<1x256xf32>
    %18 = arith.cmpf ogt, %16, %17 : vector<1x256xf32>
    %19 = arith.cmpf olt, %16, %17 : vector<1x256xf32>
    %20 = vector.shape_cast %18 : vector<1x256xi1> to vector<1x1x256xi1>
    %cst_11 = arith.constant 0.000000e+00 : f32
    %21 = vector.broadcast %cst_11 : f32 to vector<3x1x256xf32>
    %22 = arith.cmpf ogt, %2, %21 : vector<3x1x256xf32>
    %23 = vector.broadcast %20 : vector<1x1x256xi1> to vector<3x1x256xi1>
    %24 = arith.andi %23, %22 : vector<3x1x256xi1>
    %25 = vector.shape_cast %19 : vector<1x256xi1> to vector<1x1x256xi1>
    %cst_12 = arith.constant 0.000000e+00 : f32
    %26 = vector.broadcast %cst_12 : f32 to vector<3x1x256xf32>
    %27 = arith.cmpf olt, %2, %26 : vector<3x1x256xf32>
    %28 = vector.broadcast %25 : vector<1x1x256xi1> to vector<3x1x256xi1>
    %29 = arith.andi %28, %27 : vector<3x1x256xi1>
    %30 = arith.ori %24, %29 : vector<3x1x256xi1>
    %31 = vector.extract_strided_slice %30 {offsets = [0, 0, 0], sizes = [1, 1, 256], strides = [1, 1, 1]} : vector<3x1x256xi1> to vector<1x1x256xi1>
    %32 = vector.shape_cast %31 : vector<1x1x256xi1> to vector<1x256xi1>
    %33 = arith.extui %32 : vector<1x256xi1> to vector<1x256xi32>
    %34 = arith.sitofp %33 : vector<1x256xi32> to vector<1x256xf32>
    %35 = vector.extract_strided_slice %30 {offsets = [1, 0, 0], sizes = [1, 1, 256], strides = [1, 1, 1]} : vector<3x1x256xi1> to vector<1x1x256xi1>
    %36 = vector.shape_cast %35 : vector<1x1x256xi1> to vector<1x256xi1>
    %37 = arith.extui %36 : vector<1x256xi1> to vector<1x256xi32>
    %38 = arith.sitofp %37 : vector<1x256xi32> to vector<1x256xf32>
    %cst_13 = arith.constant 1.000000e+00 : f32
    %39 = vector.broadcast %cst_13 : f32 to vector<1x256xf32>
    %40 = arith.subf %39, %38 : vector<1x256xf32>
    %cst_14 = arith.constant 5.000000e-01 : f32
    %41 = vector.broadcast %cst_14 : f32 to vector<1x256xf32>
    %42 = arith.mulf %41, %40 : vector<1x256xf32>
    %43 = arith.addf %38, %42 : vector<1x256xf32>
    %cst_15 = arith.constant 1.000000e+00 : f32
    %44 = vector.broadcast %cst_15 : f32 to vector<1x256xf32>
    %45 = vector.shape_cast %34 : vector<1x256xf32> to vector<1x1x256xf32>
    %46 = vector.shape_cast %43 : vector<1x256xf32> to vector<1x1x256xf32>
    %47 = vector.shape_cast %44 : vector<1x256xf32> to vector<1x1x256xf32>
    %48 = tpu.concatenate %45, %46, %47 in 0 : vector<1x1x256xf32>, vector<1x1x256xf32>, vector<1x1x256xf32> -> vector<3x1x256xf32>
    %49 = vector.broadcast %48 : vector<3x1x256xf32> to vector<3x8x256xf32>
    %50 = arith.mulf %49, %0 : vector<3x8x256xf32>
    %c0_16 = arith.constant 0 : index
    %c0_17 = arith.constant 0 : index
    %c0_18 = arith.constant 0 : index
    %51 = vector.load %arg3[%c0_16, %c0_17, %c0_18] : memref<3x8x256xf32, #tpu.memory_space<vmem>>, vector<3x8x256xf32>
    tpu.vector_store %arg3[%c0_16, %c0_17, %c0_18], %50 {strides = array<i32>} : memref<3x8x256xf32, #tpu.memory_space<vmem>>, vector<3x8x256xf32>,
    return
  }
  func.func @transform_0(%arg0: i32) -> (i32, i32, i32) {
    %c0_i32 = arith.constant 0 : i32
    %c0_i32_0 = arith.constant 0 : i32
    %c0_i32_1 = arith.constant 0 : i32
    return %c0_i32, %c0_i32_0, %arg0 : i32, i32, i32
  }
  func.func @transform_1(%arg0: i32) -> (i32, i32) {
    %c0_i32 = arith.constant 0 : i32
    %c0_i32_0 = arith.constant 0 : i32
    return %c0_i32, %arg0 : i32, i32
  }
  func.func @transform_2(%arg0: i32) -> (i32, i32, i32) {
    %c0_i32 = arith.constant 0 : i32
    %c0_i32_0 = arith.constant 0 : i32
    %c0_i32_1 = arith.constant 0 : i32
    return %c0_i32, %c0_i32_0, %arg0 : i32, i32, i32
  }
}

</mosaic_0001>

<bundles_post_ra>
// kernel: tpu_custom_call.1
= control target key start
LH: loop header
LB: loop body
LE: loop exit
PB: predicated region body
PF: predicated region fallthrough
CT: control target
= control target key end

     0   :  { %7 = vsyncpa [#allocation3], 0  ;;  %s443_s0 = inlined_call_operand.hbm [shape: f32[3,8,256], index: 0, kind: input, shape index: {}]   ;;  %s444_s1 = inlined_call_operand.hbm [shape: f32[1,256], index: 1, kind: input, shape index: {}]   ;;  %s445_s2 = inlined_call_operand.hbm [shape: f32[3,8,256], index: 2, kind: output, shape index: {}]  }
   0x1   :  { %8 = vsyncpa [#allocation6], 0 }
   0x2   :  { %9 = vsyncpa [#allocation4], 0  ;;  %s14_s11 = sshll.u32 %s443_s0, 4  ;;  %s320_s12 = smov [#allocation2]   ;;  %s15_s11 = int_to_ptr.hbm [resolvable:$true] %s14_s11 }
   0x3   :  { %s16_s13 = sshll.u32 %s320_s12, 4  ;;  %s28_s16 = sshll.u32 %s444_s1, 4  ;;  %s17_s13 = int_to_ptr.vmem [resolvable:$true] %s16_s13  ;;  %s29_s16 = int_to_ptr.hbm [resolvable:$true] %s28_s16 }
   0x4   :  { %s321_s17 = smov 256   ;;  %s322_s18 = smov 16  }
   0x5   :  { %22 = dma.hbm_to_vmem [thread:$0]  %s15_s11, 768, %s17_s13, [#allocation3], %s321_s17, %s321_s17, %s322_s18  }
   0x6   :  { %s323_s19 = smov [#allocation5]  }
   0x7   :  { %s30_s20 = sshll.u32 %s323_s19, 4  ;;  %s31_s20 = int_to_ptr.vmem [resolvable:$true] %s30_s20 }
   0x8   :  { %33 = dma.hbm_to_vmem [thread:$0]  %s29_s16, 32, %s31_s20, [#allocation6]  }
   0x9   :  { %314 = dma.done.wait [#allocation3], 768  }
   0xa   :  { %315 = vsyncadd [#allocation3], 4294966528 }
   0xb   :  { %316 = dma.done.wait [#allocation6], 32  }
   0xc   :  { %317 = vsyncadd [#allocation6], 4294967264  ;;  %v351_v0 = vld [vmem:[#allocation2] sm:$0xff]  ;;  %v353_v1 = vld [vmem:[#allocation2 + $0x10] sm:$0xff]  ;;  %s326_s0 = smov [#allocation7]   ;;  %s213_s23 = sshll.u32 %s445_s2, 4  ;;  %s214_s23 = int_to_ptr.hbm [resolvable:$true] %s213_s23 }
   0xd   :  { %v355_v2 = vld [vmem:[#allocation2 + $0x20] sm:$0xff]  ;;  %v48_v3 = vrot.slane %v351_v0, 4  ;;  %v60_v4 = vrot.slane %v353_v1, 4  ;;  %v360_v6 = vld [vmem:[#allocation2 + $0x8] sm:$0xff]  ;;  %v362_v7 = vld [vmem:[#allocation2 + $0x18] sm:$0xff]  ;;  %s211_s1 = sshll.u32 %s326_s0, 4  ;;  %s212_s1 = int_to_ptr.vmem [resolvable:$true] %s211_s1 }
   0xe   :  { %v72_v5 = vrot.slane %v355_v2, 4  ;;  %v364_v8 = vld [vmem:[#allocation2 + $0x28] sm:$0xff]  ;;  %v54_v9 = vrot.slane %v360_v6, 4  ;;  %v66_v10 = vrot.slane %v362_v7, 4 }
   0xf   :  { %v78_v11 = vrot.slane %v364_v8, 4  ;;  %v49_v12 = vadd.f32 %v48_v3, %v351_v0  ;;  %v61_v13 = vadd.f32 %v60_v4, %v353_v1 }
  0x10   :  { %v73_v14 = vadd.f32 %v72_v5, %v355_v2  ;;  %v55_v15 = vadd.f32 %v54_v9, %v360_v6  ;;  %v67_v16 = vadd.f32 %v66_v10, %v362_v7 }
  0x11   :  { %v79_v17 = vadd.f32 %v78_v11, %v364_v8  ;;  %v50_v18 = vrot.slane %v49_v12, 2  ;;  %v62_v19 = vrot.slane %v61_v13, 2 }
  0x12   :  { %v74_v20 = vrot.slane %v73_v14, 2  ;;  %v56_v21 = vrot.slane %v55_v15, 2  ;;  %v68_v22 = vrot.slane %v67_v16, 2 }
  0x13   :  { %v80_v23 = vrot.slane %v79_v17, 2  ;;  %v51_v24 = vadd.f32 %v50_v18, %v49_v12  ;;  %v63_v25 = vadd.f32 %v62_v19, %v61_v13 }
  0x14   :  { %v75_v26 = vadd.f32 %v74_v20, %v73_v14  ;;  %v57_v27 = vadd.f32 %v56_v21, %v55_v15  ;;  %v69_v28 = vadd.f32 %v68_v22, %v67_v16 }
  0x15   :  { %v81_v29 = vadd.f32 %v80_v23, %v79_v17  ;;  %v52_v30 = vrot.slane %v51_v24, 1  ;;  %v64_v31 = vrot.slane %v63_v25, 1  ;;  %v324_v17 = vmov 1.0  }
  0x16   :  { %v76_v32 = vrot.slane %v75_v26, 1  ;;  %v58_v33 = vrot.slane %v57_v27, 1  ;;  %v70_v34 = vrot.slane %v69_v28, 1  ;;  %v194_v18 = vperm.slane %v324_v17, 0 }
  0x17   :  { %v82_v35 = vrot.slane %v81_v29, 1  ;;  %v375_v36 = vadd.f32 %v52_v30, %v51_v24  ;;  %v377_v37 = vadd.f32 %v64_v31, %v63_v25 }
  0x18   :  { %v77_v38 = vadd.f32 %v76_v32, %v75_v26  ;;  %v379_v39 = vadd.f32 %v58_v33, %v57_v27  ;;  %v381_v40 = vadd.f32 %v70_v34, %v69_v28  ;;  %v199_v23 = vmul.f32 %v194_v18, %v355_v2  ;;  %v138_v27 = vld [vmem:[#allocation5] sm:$0x3] }
  0x19   :  { %v83_v41 = vadd.f32 %v82_v35, %v81_v29  ;;  %v88_v42 = vand.u32 2147483647, %v375_v36  ;;  %v90_v43 = vand.u32 2147483647, %v377_v37  ;;  %v84_v56 = vadd.f32 %v377_v37, %v375_v36 }
  0x1a   :  { %v92_v44 = vand.u32 2147483647, %v77_v38  ;;  %v89_v45 = vand.u32 2147483647, %v379_v39  ;;  %v91_v46 = vand.u32 2147483647, %v381_v40  ;;  %v86_v59 = vadd.f32 %v381_v40, %v379_v39 }
  0x1b   :  { %v94_v47 = vadd.f32 %v90_v43, %v88_v42  ;;  %v93_v48 = vand.u32 2147483647, %v83_v41  ;;  %v85_v11 = vadd.f32 %v84_v56, %v77_v38  ;;  %v200_v24 = vmul.f32 %v194_v18, %v364_v8  ;;  %205 = vst [vmem:[#allocation7 + $0x20] sm:$0xff] %v199_v23 }
  0x1c   :  { %v96_v49 = vadd.f32 %v91_v46, %v89_v45  ;;  %v87_v14 = vadd.f32 %v86_v59, %v83_v41  ;;  %v140_v32 = vperm.slane %v138_v27, 0  ;;  %vm148_vm8 = vcmp.gt.f32.partialorder %v375_v36, 0.0 }
  0x1d   :  { %v95_v50 = vadd.f32 %v94_v47, %v92_v44  ;;  %206 = vst [vmem:[#allocation7 + $0x28] sm:$0xff] %v200_v24  ;;  %vm160_vm9 = vcmp.lt.f32.partialorder %v375_v36, 0.0  ;;  %v141_v2 = vperm.slane %v138_v27, 1  ;;  %vm149_vm13 = vcmp.gt.f32.partialorder %v379_v39, 0.0 }
  0x1e   :  { %v97_v51 = vadd.f32 %v96_v49, %v93_v48  ;;  %vm161_vm15 = vcmp.lt.f32.partialorder %v379_v39, 0.0  ;;  %v325_v41 = vmov 0.0  }
  0x1f   :  { %v98_v52 = vadd.f32 1e-15, %v95_v50 }
  0x20   :  { %v99_v53 = vadd.f32 1e-15, %v97_v51 }
  0x21   :  { %238 = vrcp.f32 %v98_v52  ;;  %vm105_vm0 = vweird.f32 %v98_v52  ;;  %v111_v58 = vand.u32 2147483648, %v98_v52  ;;  %v109_v62 = vand.u32 2147483647, %v98_v52 }
  0x22   :  { %240 = vrcp.f32 %v99_v53  ;;  %v126_v63 = vand.u32 2147483648, %v99_v53  ;;  %vm120_vm2 = vweird.f32 %v99_v53  ;;  %v124_v4 = vand.u32 2147483647, %v99_v53 }
  0x23   :  { %v112_v9 = vor.u32 1.1754944e-38, %v111_v58  ;;  %vm110_vm5 = vcmp.eq.f32.partialorder %v109_v62, 8.507059e+37 }
  0x24   :  { %v127_v13 = vor.u32 1.1754944e-38, %v126_v63  ;;  %vm125_vm7 = vcmp.eq.f32.partialorder %v124_v4, 8.507059e+37 }
  0x27   :  { %v239_v54 = vpop.eup %238 }
  0x28   :  { %v241_v55 = vpop.eup %240  ;;  %v101_v57 = vmul.f32 %v239_v54, %v98_v52  ;;  %vm106_vm1 = vweird.f32 %v239_v54 }
  0x29   :  { %v116_v60 = vmul.f32 %v241_v55, %v99_v53  ;;  %vm121_vm3 = vweird.f32 %v241_v55  ;;  %vm107_vm4 = vmor %vm105_vm0, %vm106_vm1 }
  0x2a   :  { %v102_v61 = vsub.f32 1.0, %v101_v57  ;;  %vm122_vm6 = vmor %vm120_vm2, %vm121_vm3 }
  0x2b   :  { %v117_v3 = vsub.f32 1.0, %v116_v60 }
  0x2c   :  { %v103_v5 = vmul.f32 %v239_v54, %v102_v61 }
  0x2d   :  { %v118_v10 = vmul.f32 %v241_v55, %v117_v3 }
  0x2e   :  { %v104_v12 = vadd.f32 %v239_v54, %v103_v5 }
  0x2f   :  { %v119_v15 = vadd.f32 %v241_v55, %v118_v10 }
  0x30   :  { %v108_v16 = vsel %vm107_vm4, %v239_v54, %v104_v12  ;;  %vm150_vm4 = vcmp.gt.f32.partialorder %v377_v37, 0.0 }
  0x31   :  { %v113_v19 = vsel %vm110_vm5, %v112_v9, %v108_v16  ;;  %v123_v20 = vsel %vm122_vm6, %v241_v55, %v119_v15  ;;  %vm162_vm6 = vcmp.lt.f32.partialorder %v377_v37, 0.0 }
  0x32   :  { %v114_v21 = vmul.f32 %v113_v19, %v85_v11  ;;  %v128_v22 = vsel %vm125_vm7, %v127_v13, %v123_v20 }
  0x33   :  { %v129_v25 = vmul.f32 %v128_v22, %v87_v14 }
  0x34   :  { %v130_v26 = vadd.f32 1.0, %v114_v21 }
  0x35   :  { %v131_v28 = vadd.f32 1.0, %v129_v25 }
  0x36   :  { %v132_v29 = vmul.f32 0.5, %v130_v26 }
  0x37   :  { %v133_v30 = vmul.f32 0.5, %v131_v28 }
  0x38   :  { %v134_v31 = vmax.f32 %v132_v29, 0.0 }
  0x39   :  { %v135_v33 = vmax.f32 %v133_v30, 0.0 }
  0x3a   :  { %v136_v34 = vmin.f32 %v134_v31, 1.0 }
  0x3b   :  { %v137_v35 = vmin.f32 %v135_v33, 1.0 }
  0x3c   :  { %vm395_vm10 = vcmp.gt.f32.partialorder %v136_v34, %v140_v32  ;;  %vm399_vm11 = vcmp.lt.f32.partialorder %v136_v34, %v140_v32 }
  0x3d   :  { %vm156_vm12 = vmand %vm395_vm10, %vm148_vm8  ;;  %vm409_vm1 = vcmp.gt.f32.partialorder %v137_v35, %v141_v2  ;;  %vm413_vm2 = vcmp.lt.f32.partialorder %v137_v35, %v141_v2 }
  0x3e   :  { %vm168_vm14 = vmand %vm399_vm11, %vm160_vm9  ;;  %vm151_vm9 = vcmp.gt.f32.partialorder %v381_v40, 0.0 }
  0x3f   :  { %vm172_vm0 = vmor %vm156_vm12, %vm168_vm14 }
  0x40   :  { %v227_v42 = vsel %vm172_vm0, 1.0, %v325_v41  ;;  %vm157_vm3 = vmand %vm409_vm1, %vm149_vm13  ;;  %vm163_vm13 = vcmp.lt.f32.partialorder %v381_v40, 0.0 }
  0x41   :  { %v190_v44 = vperm.slane %v227_v42, 0  ;;  %vm169_vm5 = vmand %vm413_vm2, %vm161_vm15 }
  0x42   :  { %vm173_vm7 = vmor %vm157_vm3, %vm169_vm5 }
  0x43   :  { %v195_v39 = vmul.f32 %v190_v44, %v351_v0  ;;  %v228_v45 = vsel %vm173_vm7, 1.0, %v325_v41  ;;  %vm158_vm8 = vmand %vm395_vm10, %vm150_vm4 }
  0x44   :  { %v191_v46 = vperm.slane %v228_v45, 0  ;;  %vm170_vm12 = vmand %vm399_vm11, %vm162_vm6 }
  0x45   :  { %201 = vst [vmem:[#allocation7] sm:$0xff] %v195_v39  ;;  %vm174_vm14 = vmor %vm158_vm8, %vm170_vm12 }
  0x46   :  { %v196_v47 = vmul.f32 %v191_v46, %v360_v6  ;;  %v229_v37 = vsel %vm174_vm14, 1.0, %v325_v41  ;;  %vm159_vm15 = vmand %vm409_vm1, %vm151_vm9 }
  0x47   :  { %v184_v0 = vsub.f32 1.0, %v229_v37  ;;  %vm171_vm10 = vmand %vm413_vm2, %vm163_vm13 }
  0x48   :  { %202 = vst [vmem:[#allocation7 + $0x8] sm:$0xff] %v196_v47  ;;  %vm175_vm0 = vmor %vm159_vm15, %vm171_vm10 }
  0x49   :  { %v186_v48 = vmul.f32 0.5, %v184_v0  ;;  %v230_v49 = vsel %vm175_vm0, 1.0, %v325_v41 }
  0x4a   :  { %v185_v50 = vsub.f32 1.0, %v230_v49 }
  0x4b   :  { %v188_v51 = vadd.f32 %v229_v37, %v186_v48 }
  0x4c   :  { %v187_v52 = vmul.f32 0.5, %v185_v50 }
  0x4d   :  { %v192_v40 = vperm.slane %v188_v51, 0 }
  0x4e   :  { %v189_v53 = vadd.f32 %v230_v49, %v187_v52 }
  0x4f   :  { %v197_v54 = vmul.f32 %v192_v40, %v353_v1 }
  0x50   :  { %v193_v6 = vperm.slane %v189_v53, 0 }
  0x51   :  { %203 = vst [vmem:[#allocation7 + $0x10] sm:$0xff] %v197_v54 }
  0x52   :  { %v198_v55 = vmul.f32 %v193_v6, %v362_v7 }
  0x54   :  { %204 = vst [vmem:[#allocation7 + $0x18] sm:$0xff] %v198_v55 }
  0x55   :  { %219 = dma.vmem_to_hbm [thread:$0]  %s212_s1, 768, %s214_s23, [#allocation4], %s321_s17, %s321_s17, %s322_s18  }
  0x56   :  { %318 = dma.done.wait [#allocation4], 768  }
  0x57   :  { %319 = vsyncadd [#allocation4], 4294966528 }
  0x58   :  { %224 = vsyncpa [#allocation3], 1 }
  0x59   :  { %225 = vsyncpa [#allocation6], 1 }
  0x5a   :  { %226 = vsyncpa [#allocation4], 1 }

</bundles_post_ra>
